<compile_context>
chip_gen: v7x
topology: tpu7x:2x2x1
jax: 0.10.0
libtpu: 0.0.40
codegen_flags: <defaults>
</compile_context>

<pallas_src>
import jax
import jax.numpy as jnp
from jax.experimental import pallas as pl
from jax.experimental.pallas import tpu as pltpu


def shared_value_kernel(x_ref, w1_ref, b1_ref, w2_ref, b2_ref, pi_ref, vf_ref):
    """Fused 2-layer MLP for both branches on one batch tile.

    x_ref  : [tile, F]        input features
    w1_ref : [F, 2*H1]        [Wpi1 | Wvf1]
    b1_ref : [1, 2*H1]        [bpi1 | bvf1]
    w2_ref : [2*H1, 2*H2]     blockdiag(Wpi2, Wvf2)
    b2_ref : [1, 2*H2]        [bpi2 | bvf2]
    pi_ref : [tile, H2]       policy features
    vf_ref : [tile, H2]       value features
    """
    h2 = pi_ref.shape[-1]

    # MXU consumes the native (possibly bf16) operands; accumulate in f32.
    x = x_ref[...]
    w1 = w1_ref[...]
    z1 = jnp.dot(x, w1, preferred_element_type=jnp.float32)
    h = jnp.tanh(z1 + b1_ref[...].astype(jnp.float32))          # f32 tanh (EUP)

    w2 = w2_ref[...]
    z2 = jnp.dot(h.astype(w2.dtype), w2, preferred_element_type=jnp.float32)
    y = jnp.tanh(z2 + b2_ref[...].astype(jnp.float32))          # [tile, 2*H2]

    pi_ref[...] = y[:, :h2].astype(pi_ref.dtype)
    vf_ref[...] = y[:, h2:].astype(vf_ref.dtype)


def _round_up(n, m):
    return -(-n // m) * m


def _sublane(dtype):
    # Native sublane multiple: 8 for f32, 16 for bf16, 32 for int8.
    return max(8, 32 // jnp.dtype(dtype).itemsize)


def fuse_params(params):
    """Build the fused / block-diagonal weights ONCE (cache outside forward)."""
    h1 = params["wpi1"].shape[1]
    h2 = params["wpi2"].shape[1]
    wdt = params["wpi1"].dtype
    w1 = jnp.concatenate([params["wpi1"], params["wvf1"]], axis=1)      # [F, 2*H1]
    b1 = jnp.concatenate([params["bpi1"], params["bvf1"]], axis=1)      # [1, 2*H1]
    zeros = jnp.zeros((h1, h2), wdt)
    w2 = jnp.concatenate(
        [jnp.concatenate([params["wpi2"], zeros], axis=1),
         jnp.concatenate([zeros, params["wvf2"]], axis=1)], axis=0)     # [2*H1, 2*H2]
    b2 = jnp.concatenate([params["bpi2"], params["bvf2"]], axis=1)      # [1, 2*H2]
    return dict(w1=w1, b1=b1, w2=w2, b2=b2)


def shared_value_forward(x, fused, *, batch_tile=None):
    """SharedValueNetwork.forward.

    x     : [B, feature_dim]
    fused : output of fuse_params(params)
    returns (policy_features [B, H2], value_features [B, H2]) in x.dtype.
    """
    B, F = x.shape
    H1x2 = fused["w1"].shape[1]
    H2x2 = fused["w2"].shape[1]
    H2 = H2x2 // 2
    sub = _sublane(x.dtype)
    itemsize = jnp.dtype(x.dtype).itemsize

    # ---- batch tile heuristic (no padding; partial last block is masked) ----
    if batch_tile is None:
        if B <= 8 * sub:
            # Tiny batch: a single grid step, rounded to the sublane multiple.
            batch_tile = _round_up(max(B, 1), sub)
        else:
            # >= 2 parallel steps keeps both v7x TensorCores busy; cap at 2048
            # rows so huge batches amortize per-step overhead without blowing
            # the scoped-VMEM budget.
            batch_tile = min(_round_up(pl.cdiv(B, 2), sub), 2048)
            # VMEM guard: x tile + both outputs, double-buffered, stays small.
            row_bytes = (F + H2x2) * itemsize
            max_rows = (12 * 1024 * 1024) // max(row_bytes, 1)
            batch_tile = max(sub, min(batch_tile, (max_rows // sub) * sub))
    grid = (pl.cdiv(B, batch_tile),)

    # Weights/biases: full-array blocks, constant index_map -> fetched into
    # VMEM once and never re-DMA'd across grid steps.
    in_specs = [
        pl.BlockSpec((batch_tile, F), lambda i: (i, 0)),     # x tile
        pl.BlockSpec((F, H1x2), lambda i: (0, 0)),           # fused W1
        pl.BlockSpec((1, H1x2), lambda i: (0, 0)),           # fused b1
        pl.BlockSpec((H1x2, H2x2), lambda i: (0, 0)),        # block-diag W2
        pl.BlockSpec((1, H2x2), lambda i: (0, 0)),           # fused b2
    ]
    out_specs = (
        pl.BlockSpec((batch_tile, H2), lambda i: (i, 0)),    # pi
        pl.BlockSpec((batch_tile, H2), lambda i: (i, 0)),    # vf
    )
    out_shape = (
        jax.ShapeDtypeStruct((B, H2), x.dtype),
        jax.ShapeDtypeStruct((B, H2), x.dtype),
    )

    cost = pl.CostEstimate(
        flops=int(2 * B * (F * H1x2 + H1x2 * H2x2)),
        transcendentals=int(B * (H1x2 + H2x2)),
        bytes_accessed=int((B * F + 2 * B * H2) * itemsize
                           + (F * H1x2 + H1x2 * H2x2 + H1x2 + H2x2) * itemsize),
    )

    fn = pl.pallas_call(
        shared_value_kernel,
        grid=grid,
        in_specs=in_specs,
        out_specs=out_specs,
        out_shape=out_shape,
        compiler_params=pltpu.CompilerParams(
            dimension_semantics=("parallel",)),
        cost_estimate=cost,
    )
    pi, vf = fn(x, fused["w1"], fused["b1"], fused["w2"], fused["b2"])
    return pi, vf


def init_params(key, feature_dim, hidden=(64, 64)):
    """Deterministic synthetic init (PyTorch-Linear-style uniform fan-in)."""
    h1, h2 = hidden
    keys = jax.random.split(key, 8)

    def linear(kw, kb, fan_in, fan_out):
        bound = 1.0 / jnp.sqrt(fan_in)
        w = jax.random.uniform(kw, (fan_in, fan_out), jnp.float32, -bound, bound)
        b = jax.random.uniform(kb, (1, fan_out), jnp.float32, -bound, bound)
        return w, b

    wpi1, bpi1 = linear(keys[0], keys[1], feature_dim, h1)
    wpi2, bpi2 = linear(keys[2], keys[3], h1, h2)
    wvf1, bvf1 = linear(keys[4], keys[5], feature_dim, h1)
    wvf2, bvf2 = linear(keys[6], keys[7], h1, h2)
    return dict(wpi1=wpi1, bpi1=bpi1, wpi2=wpi2, bpi2=bpi2,
                wvf1=wvf1, bvf1=bvf1, wvf2=wvf2, bvf2=bvf2)


def reference_forward(x, p):
    """Pure-JAX reference mirroring the PyTorch forward."""
    h_pi = jnp.tanh(x @ p["wpi1"] + p["bpi1"])
    pi = jnp.tanh(h_pi @ p["wpi2"] + p["bpi2"])
    h_vf = jnp.tanh(x @ p["wvf1"] + p["bvf1"])
    vf = jnp.tanh(h_vf @ p["wvf2"] + p["bvf2"])
    return pi, vf


if __name__ == "__main__":
    key = jax.random.PRNGKey(0)
    k_x, k_x2, k_p = jax.random.split(key, 3)

    feature_dim, hidden = 32, (64, 64)
    params = init_params(k_p, feature_dim, hidden=hidden)
    fused = fuse_params(params)  # fused weights built once, reused every call

    # Small batch (single grid step).
    batch = 16
    x = jax.random.normal(k_x, (batch, feature_dim), jnp.float32)
    pi, vf = shared_value_forward(x, fused)
    jax.block_until_ready((pi, vf))
    pi_ref, vf_ref = reference_forward(x, params)
    assert pi.shape == (batch, hidden[1]) and vf.shape == (batch, hidden[1])
    assert jnp.allclose(pi, pi_ref, atol=1e-5)
    assert jnp.allclose(vf, vf_ref, atol=1e-5)

    # Ragged batch: 2 parallel grid steps with a masked partial last block,
    # no jnp.pad copy and no post-kernel slice pass.
    batch2 = 300
    x2 = jax.random.normal(k_x2, (batch2, feature_dim), jnp.float32)
    pi2, vf2 = shared_value_forward(x2, fused)
    jax.block_until_ready((pi2, vf2))
    pi2_ref, vf2_ref = reference_forward(x2, params)
    assert pi2.shape == (batch2, hidden[1]) and vf2.shape == (batch2, hidden[1])
    assert jnp.allclose(pi2, pi2_ref, atol=1e-5)
    assert jnp.allclose(vf2, vf2_ref, atol=1e-5)

    # bf16 path: native bf16 MXU operands with f32 accumulation, bf16 stores.
    params_bf16 = jax.tree_util.tree_map(
        lambda a: a.astype(jnp.bfloat16), params)
    fused_bf16 = fuse_params(params_bf16)
    x2_bf16 = x2.astype(jnp.bfloat16)
    pi3, vf3 = shared_value_forward(x2_bf16, fused_bf16)
    jax.block_until_ready((pi3, vf3))
    pi3_ref, vf3_ref = reference_forward(
        x2_bf16.astype(jnp.float32),
        jax.tree_util.tree_map(lambda a: a.astype(jnp.float32), params_bf16))
    assert pi3.dtype == jnp.bfloat16 and vf3.dtype == jnp.bfloat16
    assert jnp.allclose(pi3.astype(jnp.float32), pi3_ref, atol=5e-2)
    assert jnp.allclose(vf3.astype(jnp.float32), vf3_ref, atol=5e-2)

    print("KERNEL_OK")
</pallas_src>

<mosaic_0001>
module attributes {stable_mosaic.version = 11 : i64} {
  func.func @shared_value_kernel(%arg0: i32, %arg1: memref<16x32xf32, #tpu.memory_space<vmem>>, %arg2: memref<32x128xf32, #tpu.memory_space<vmem>>, %arg3: memref<1x128xf32, #tpu.memory_space<vmem>>, %arg4: memref<128x128xf32, #tpu.memory_space<vmem>>, %arg5: memref<1x128xf32, #tpu.memory_space<vmem>>, %arg6: memref<16x64xf32, #tpu.memory_space<vmem>>, %arg7: memref<16x64xf32, #tpu.memory_space<vmem>>) attributes {dimension_semantics = [#tpu.dimension_semantics<parallel>], iteration_bounds = array<i64: 1>, scalar_prefetch = 0 : i64, scratch_operands = 0 : i64, tpu.core_type = #tpu.core_type<tc>, window_params = [{transform_indices = @transform_0, window_bounds = array<i64: 16, 32>}, {pipeline_mode = #tpu.pipeline_mode<synchronous>, transform_indices = @transform_1, window_bounds = array<i64: 32, 128>}, {pipeline_mode = #tpu.pipeline_mode<synchronous>, transform_indices = @transform_2, window_bounds = array<i64: 1, 128>}, {pipeline_mode = #tpu.pipeline_mode<synchronous>, transform_indices = @transform_3, window_bounds = array<i64: 128, 128>}, {pipeline_mode = #tpu.pipeline_mode<synchronous>, transform_indices = @transform_4, window_bounds = array<i64: 1, 128>}, {transform_indices = @transform_5, window_bounds = array<i64: 16, 64>}, {transform_indices = @transform_6, window_bounds = array<i64: 16, 64>}]} {
    %c0 = arith.constant 0 : index
    %c0_0 = arith.constant 0 : index
    %0 = vector.load %arg1[%c0, %c0_0] : memref<16x32xf32, #tpu.memory_space<vmem>>, vector<16x32xf32>
    %c0_1 = arith.constant 0 : index
    %c0_2 = arith.constant 0 : index
    %1 = vector.load %arg2[%c0_1, %c0_2] : memref<32x128xf32, #tpu.memory_space<vmem>>, vector<32x128xf32>
    %cst = arith.constant dense<0.000000e+00> : vector<16x128xf32>
    %2 = tpu.matmul %0, %1, %cst {dimension_numbers = #tpu.dot_dimension_numbers<[1], [0], [0], [1], [0, 0, 1, 1], [], []>} : vector<16x32xf32>, vector<32x128xf32>, vector<16x128xf32> -> vector<16x128xf32>
    %c0_3 = arith.constant 0 : index
    %c0_4 = arith.constant 0 : index
    %3 = vector.load %arg3[%c0_3, %c0_4] : memref<1x128xf32, #tpu.memory_space<vmem>>, vector<1x128xf32>
    %4 = vector.broadcast %3 : vector<1x128xf32> to vector<16x128xf32>
    %5 = arith.addf %2, %4 : vector<16x128xf32>
    %6 = math.tanh %5 : vector<16x128xf32>
    %c0_5 = arith.constant 0 : index
    %c0_6 = arith.constant 0 : index
    %7 = vector.load %arg4[%c0_5, %c0_6] : memref<128x128xf32, #tpu.memory_space<vmem>>, vector<128x128xf32>
    %cst_7 = arith.constant dense<0.000000e+00> : vector<16x128xf32>
    %8 = tpu.matmul %6, %7, %cst_7 {dimension_numbers = #tpu.dot_dimension_numbers<[1], [0], [0], [1], [0, 0, 1, 1], [], []>} : vector<16x128xf32>, vector<128x128xf32>, vector<16x128xf32> -> vector<16x128xf32>
    %c0_8 = arith.constant 0 : index
    %c0_9 = arith.constant 0 : index
    %9 = vector.load %arg5[%c0_8, %c0_9] : memref<1x128xf32, #tpu.memory_space<vmem>>, vector<1x128xf32>
    %10 = vector.broadcast %9 : vector<1x128xf32> to vector<16x128xf32>
    %11 = arith.addf %8, %10 : vector<16x128xf32>
    %12 = math.tanh %11 : vector<16x128xf32>
    %13 = vector.extract_strided_slice %12 {offsets = [0, 0], sizes = [16, 64], strides = [1, 1]} : vector<16x128xf32> to vector<16x64xf32>
    %c0_10 = arith.constant 0 : index
    %c0_11 = arith.constant 0 : index
    %14 = vector.load %arg6[%c0_10, %c0_11] : memref<16x64xf32, #tpu.memory_space<vmem>>, vector<16x64xf32>
    tpu.vector_store %arg6[%c0_10, %c0_11], %13 {strides = array<i32>} : memref<16x64xf32, #tpu.memory_space<vmem>>, vector<16x64xf32>,
    %15 = vector.extract_strided_slice %12 {offsets = [0, 64], sizes = [16, 64], strides = [1, 1]} : vector<16x128xf32> to vector<16x64xf32>
    %c0_12 = arith.constant 0 : index
    %c0_13 = arith.constant 0 : index
    %16 = vector.load %arg7[%c0_12, %c0_13] : memref<16x64xf32, #tpu.memory_space<vmem>>, vector<16x64xf32>
    tpu.vector_store %arg7[%c0_12, %c0_13], %15 {strides = array<i32>} : memref<16x64xf32, #tpu.memory_space<vmem>>, vector<16x64xf32>,
    return
  }
  func.func @transform_0(%arg0: i32) -> (i32, i32) {
    %c0_i32 = arith.constant 0 : i32
    %c0_i32_0 = arith.constant 0 : i32
    return %arg0, %c0_i32 : i32, i32
  }
  func.func @transform_1(%arg0: i32) -> (i32, i32) {
    %c0_i32 = arith.constant 0 : i32
    %c0_i32_0 = arith.constant 0 : i32
    %c0_i32_1 = arith.constant 0 : i32
    return %c0_i32, %c0_i32_0 : i32, i32
  }
  func.func @transform_2(%arg0: i32) -> (i32, i32) {
    %c0_i32 = arith.constant 0 : i32
    %c0_i32_0 = arith.constant 0 : i32
    %c0_i32_1 = arith.constant 0 : i32
    return %c0_i32, %c0_i32_0 : i32, i32
  }
  func.func @transform_3(%arg0: i32) -> (i32, i32) {
    %c0_i32 = arith.constant 0 : i32
    %c0_i32_0 = arith.constant 0 : i32
    %c0_i32_1 = arith.constant 0 : i32
    return %c0_i32, %c0_i32_0 : i32, i32
  }
  func.func @transform_4(%arg0: i32) -> (i32, i32) {
    %c0_i32 = arith.constant 0 : i32
    %c0_i32_0 = arith.constant 0 : i32
    %c0_i32_1 = arith.constant 0 : i32
    return %c0_i32, %c0_i32_0 : i32, i32
  }
  func.func @transform_5(%arg0: i32) -> (i32, i32) {
    %c0_i32 = arith.constant 0 : i32
    %c0_i32_0 = arith.constant 0 : i32
    return %arg0, %c0_i32 : i32, i32
  }
  func.func @transform_6(%arg0: i32) -> (i32, i32) {
    %c0_i32 = arith.constant 0 : i32
    %c0_i32_0 = arith.constant 0 : i32
    return %arg0, %c0_i32 : i32, i32
  }
}

</mosaic_0001>

<bundles_post_ra>
// kernel: tpu_custom_call.1
= control target key start
LH: loop header
LB: loop body
LE: loop exit
PB: predicated region body
PF: predicated region fallthrough
CT: control target
= control target key end

     0   :  { %12 = vsyncpa [#allocation3], 0  ;;  %s694_s0 = inlined_call_operand.hbm [shape: f32[16,32], index: 0, kind: input, shape index: {}]   ;;  %s695_s1 = inlined_call_operand.hbm [shape: f32[32,128], index: 1, kind: input, shape index: {}]   ;;  %s696_s2 = inlined_call_operand.vmem [shape: f32[1,128], index: 2, kind: input, shape index: {}]   ;;  %s697_s3 = inlined_call_operand.hbm [shape: f32[128,128], index: 3, kind: input, shape index: {}]   ;;  %s698_s4 = inlined_call_operand.vmem [shape: f32[1,128], index: 4, kind: input, shape index: {}]   ;;  %s699_s5 = inlined_call_operand.hbm [shape: f32[16,64], index: 5, kind: output, shape index: {0}]   ;;  %s700_s6 = inlined_call_operand.hbm [shape: f32[16,64], index: 6, kind: output, shape index: {1}]  }
   0x1   :  { %13 = vsyncpa [#allocation6], 0 }
   0x2   :  { %14 = vsyncpa [#allocation4], 0 }
   0x3   :  { %15 = vsyncpa [#allocation10], 0  ;;  %s557_s21 = smov [#allocation5]   ;;  %s558_s23 = smov [#allocation2]  }
   0x4   :  { %s33_s22 = sshll.u32 %s557_s21, 4  ;;  %s21_s24 = sshll.u32 %s558_s23, 4  ;;  %s34_s22 = int_to_ptr.vmem [resolvable:$true] %s33_s22  ;;  %s600_s24 = int_to_ptr.vmem [resolvable:$true] %s21_s24 }
   0x5   :  { %s439_s27 = scalar_lea.hbm %s695_s1, 512 }
   0x6   :  { %p440_p0 = scmp.ne.s32.totalorder %s695_s1, %s439_s27  ;;  %p443_p1 = scmp.lt.u32.totalorder %s439_s27, %s695_s1 }
   0x8   :  { %p445_p2 = pnand %p443_p1, %p440_p0 }
   0xa   :  { %448 = shalt.err (!%p445_p2)
}
   0xb   :  { %s449_s8 = scalar_lea.vmem %s34_s22, 512  ;;  %p454_p4 = scmp.lt.s32.totalorder %s34_s22, %s34_s22 }
   0xc   :  { %p450_p3 = scmp.ne.s32.totalorder %s34_s22, %s449_s8  ;;  %p455_p5 = scmp.lt.s32.totalorder %s449_s8, %s449_s8 }
   0xe   :  { %p456_p6 = por %p455_p5, %p454_p4 }
  0x10   :  { %p457_p7 = pnand %p456_p6, %p450_p3 }
  0x12   :  { %460 = shalt.err (!%p457_p7)
}
  0x13   :  { %s559_s9 = smov 128   ;;  %s560_s10 = smov 8  }
  0x14   :  { %39 = dma.hbm_to_vmem [thread:$0]  %s695_s1, 512, %s34_s22, [#allocation6], %s559_s9, %s559_s9, %s560_s10  }
  0x15   :  { %s461_s15 = scalar_lea.hbm %s694_s0, 256 }
  0x16   :  { %p462_p8 = scmp.ne.s32.totalorder %s694_s0, %s461_s15  ;;  %p465_p9 = scmp.lt.u32.totalorder %s461_s15, %s694_s0 }
  0x18   :  { %p467_p10 = pnand %p465_p9, %p462_p8 }
  0x1a   :  { %470 = shalt.err (!%p467_p10)
}
  0x1b   :  { %s471_s20 = scalar_lea.vmem %s600_s24, 256  ;;  %p476_p12 = scmp.lt.s32.totalorder %s600_s24, %s600_s24 }
  0x1c   :  { %p472_p11 = scmp.ne.s32.totalorder %s600_s24, %s471_s20  ;;  %p477_p13 = scmp.lt.s32.totalorder %s471_s20, %s471_s20 }
  0x1e   :  { %p478_p0 = por %p477_p13, %p476_p12 }
  0x20   :  { %p479_p1 = pnand %p478_p0, %p472_p11 }
  0x22   :  { %482 = shalt.err (!%p479_p1)
}
  0x23   :  { %27 = dma.hbm_to_vmem [thread:$0]  %s694_s0, 256, %s600_s24, [#allocation3], %s559_s9, %s559_s9, %s560_s10  }
  0x24   :  { %s561_s22 = smov [#allocation7]   ;;  %s483_s27 = scalar_lea.hbm %s697_s3, 2048 }
  0x25   :  { %s47_s23 = sshll.u32 %s561_s22, 4  ;;  %p484_p2 = scmp.ne.s32.totalorder %s697_s3, %s483_s27  ;;  %s48_s23 = int_to_ptr.vmem [resolvable:$true] %s47_s23 }
  0x26   :  { %p487_p3 = scmp.lt.u32.totalorder %s483_s27, %s697_s3 }
  0x28   :  { %p489_p4 = pnand %p487_p3, %p484_p2 }
  0x2a   :  { %492 = shalt.err (!%p489_p4)
}
  0x2b   :  { %s493_s8 = scalar_lea.vmem %s48_s23, 2048  ;;  %p498_p6 = scmp.lt.s32.totalorder %s48_s23, %s48_s23 }
  0x2c   :  { %p494_p5 = scmp.ne.s32.totalorder %s48_s23, %s493_s8  ;;  %p499_p7 = scmp.lt.s32.totalorder %s493_s8, %s493_s8 }
  0x2e   :  { %p500_p8 = por %p499_p7, %p498_p6 }
  0x30   :  { %p501_p9 = pnand %p500_p8, %p494_p5 }
  0x32   :  { %504 = shalt.err (!%p501_p9)
}
  0x33   :  { %53 = dma.hbm_to_vmem [thread:$0]  %s697_s3, 2048, %s48_s23, [#allocation6], %s559_s9, %s559_s9, %s560_s10  }
  0x34   :  { %549 = dma.done.wait [#allocation3], 256  }
  0x35   :  { %550 = vsyncadd [#allocation3], 4294967040 }
  0x36   :  { %551 = dma.done.wait [#allocation6], 2560  }
  0x37   :  { %552 = vsyncadd [#allocation6], 4294964736  ;;  %vm78_vm0 = vcmask 261120   ;;  %v67_v0 = vld [vmem:[#allocation5] sm:$0xff]  ;;  %v68_v1 = vld [vmem:[#allocation5 + $0x8] sm:$0xff]  ;;  %vm262_vm1 = vcmask 523264  }
  0x38   :  { %v69_v2 = vld [vmem:[#allocation5 + $0x10] sm:$0xff]  ;;  %v383_v3 = vpack.c.bf16 %v68_v1, %v67_v0  ;;  %v70_v4 = vld [vmem:[#allocation5 + $0x18] sm:$0xff]  ;;  %v162_v7 = vld [vmem:[#allocation7] sm:$0xff]  ;;  %s563_s15 = smov 64  }
  0x39   :  { %v65_v5 = vld [vmem:[#allocation2] sm:$0xff]  ;;  %v387_v6 = vpack.c.bf16 %v70_v4, %v69_v2  ;;  %v163_v8 = vld [vmem:[#allocation7 + $0x8] sm:$0xff]  ;;  %v165_v11 = vld [vmem:[#allocation7 + $0x18] sm:$0xff] }
  0x3a   :  { %345 = vmatprep.mubr.msk.f32.mxu0 %vm78_vm0, %v65_v5  ;;  %v164_v9 = vld [vmem:[#allocation7 + $0x10] sm:$0xff]  ;;  %384 = vmatprep.subr.bf16.mxu0 %v383_v3  ;;  %v391_v10 = vpack.c.bf16 %v163_v8, %v162_v7  ;;  %v166_v13 = vld [vmem:[#allocation7 + $0x20] sm:$0xff]  ;;  %v167_v14 = vld [vmem:[#allocation7 + $0x28] sm:$0xff] }
  0x3b   :  { %386 = vmatpush3.bf16.msra.mxu0 %v383_v3  ;;  %v395_v12 = vpack.c.bf16 %v165_v11, %v164_v9  ;;  %v399_v15 = vpack.c.bf16 %v167_v14, %v166_v13  ;;  %v66_v16 = vld [vmem:[#allocation2 + $0x8] sm:$0xff]  ;;  %v168_v17 = vld [vmem:[#allocation7 + $0x30] sm:$0xff]  ;;  %v170_v20 = vld [vmem:[#allocation7 + $0x40] sm:$0xff] }
  0x3c   :  { %388 = vmatprep.subr.bf16.mxu0 %v387_v6  ;;  %392 = vmatprep.subr.bf16.mxu1 %v391_v10  ;;  %v169_v18 = vld [vmem:[#allocation7 + $0x38] sm:$0xff]  ;;  %v171_v21 = vld [vmem:[#allocation7 + $0x48] sm:$0xff]  ;;  %v172_v23 = vld [vmem:[#allocation7 + $0x50] sm:$0xff] }
  0x3d   :  { %394 = vmatpush3.bf16.msra.mxu1 %v391_v10  ;;  %v403_v19 = vpack.c.bf16 %v169_v18, %v168_v17  ;;  %v407_v22 = vpack.c.bf16 %v171_v21, %v170_v20  ;;  %v173_v24 = vld [vmem:[#allocation7 + $0x58] sm:$0xff]  ;;  %v174_v26 = vld [vmem:[#allocation7 + $0x60] sm:$0xff]  ;;  %v175_v27 = vld [vmem:[#allocation7 + $0x68] sm:$0xff] }
  0x3e   :  { %396 = vmatprep.subr.bf16.mxu1 %v395_v12  ;;  %v411_v25 = vpack.c.bf16 %v173_v24, %v172_v23  ;;  %v176_v28 = vld [vmem:[#allocation7 + $0x70] sm:$0xff]  ;;  %v415_v29 = vpack.c.bf16 %v175_v27, %v174_v26  ;;  %v177_v30 = vld [vmem:[#allocation7 + $0x78] sm:$0xff] }
  0x3f   :  { %390 = vmatpush3.bf16.msra.mxu0 %v387_v6  ;;  %v419_v31 = vpack.c.bf16 %v177_v30, %v176_v28  ;;  %v309_v32 = vld [vmem:[%s696_s2] ss:$0 sm:$0xff]  ;;  %s562_s2 = smov [#allocation8]  }
  0x40   :  { %v312_v39 = vld [vmem:[%s698_s4] ss:$0 sm:$0xff]  ;;  %s280_s14 = sshll.u32 %s562_s2, 4  ;;  %s281_s14 = int_to_ptr.vmem [resolvable:$true] %s280_s14 }
  0x41   :  { %398 = vmatpush3.bf16.msra.mxu1 %v395_v12  ;;  %s505_s16 = scalar_lea.vmem %s281_s14, 256  ;;  %p510_p11 = scmp.lt.s32.totalorder %s281_s14, %s281_s14 }
  0x42   :  { %346 = vmatmul.mubr.msk.f32.vlgmr.msra.gmra.mrb[0].mxu0 %vm78_vm0, %v66_v16  ;;  %400 = vmatprep.subr.bf16.mxu1 %v399_v15  ;;  %p506_p10 = scmp.ne.s32.totalorder %s281_s14, %s505_s16  ;;  %p511_p12 = scmp.lt.s32.totalorder %s505_s16, %s505_s16 }
  0x44   :  { %p512_p13 = por %p511_p12, %p510_p11 }
  0x45   :  { %402 = vmatpush3.bf16.msra.mxu1 %v399_v15 }
  0x46   :  { %404 = vmatprep.subr.bf16.mxu1 %v403_v19  ;;  %p513_p0 = pnand %p512_p13, %p506_p10 }
  0x49   :  { %406 = vmatpush3.bf16.msra.mxu1 %v403_v19 }
  0x4a   :  { %408 = vmatprep.subr.bf16.mxu1 %v407_v22 }
  0x4d   :  { %410 = vmatpush3.bf16.msra.mxu1 %v407_v22 }
  0x4e   :  { %412 = vmatprep.subr.bf16.mxu1 %v411_v25 }
  0x51   :  { %414 = vmatpush3.bf16.msra.mxu1 %v411_v25 }
  0x52   :  { %416 = vmatprep.subr.bf16.mxu1 %v415_v29 }
  0x55   :  { %418 = vmatpush3.bf16.msra.mxu1 %v415_v29 }
  0x56   :  { %420 = vmatprep.subr.bf16.mxu1 %v419_v31 }
  0x59   :  { %422 = vmatpush3.bf16.msra.mxu1 %v419_v31 }
 0x115   :  { %v347_v33 = vpop.f32.mrb[0].mxu0 }
 0x116   :  { %v157_v34 = vadd.f32 %v347_v33, %v309_v32  ;;  %v151_v35 = vpop.f32.mrb[1].mxu0 }
 0x117   :  { %v152_v36 = vadd.f32 %v309_v32, %v151_v35 }
 0x119   :  { %431 = vtanh.f32 %v152_v36 }
 0x11a   :  { %433 = vtanh.f32 %v157_v34 }
 0x123   :  { %v432_v37 = vpop.eup %431 }
 0x124   :  { %v434_v38 = vpop.eup %433  ;;  %380 = vmatprep.mubr.f32.mxu1 %v432_v37 }
 0x125   :  { %381 = vmatmul.mubr.f32.vlgmr.msra.gmra.mrb[0].mxu1 %v434_v38 }
 0x1f8   :  { %v382_v40 = vpop.f32.mrb[0].mxu1 }
 0x1f9   :  { %v257_v41 = vadd.f32 %v382_v40, %v312_v39  ;;  %v251_v42 = vpop.f32.mrb[1].mxu1 }
 0x1fa   :  { %v252_v43 = vadd.f32 %v312_v39, %v251_v42 }
 0x1fb   :  { %435 = vtanh.f32 %v257_v41 }
 0x1fc   :  { %437 = vtanh.f32 %v252_v43 }
 0x205   :  { %v436_v44 = vpop.eup %435 }
 0x206   :  { %v438_v45 = vpop.eup %437  ;;  %264 = vst.msk [vmem:[#allocation8 + $0x8] sm:$0xff] %vm262_vm1, %v436_v44 }
 0x207   :  { %267 = vrot.lane.b32.xlu0 %v438_v45, %s563_s15  ;;  %263 = vst.msk [vmem:[#allocation8] sm:$0xff] %vm262_vm1, %v438_v45 }
 0x208   :  { %516 = shalt.err (!%p513_p0)
}
 0x209   :  { %s517_s18 = scalar_lea.hbm %s699_s5, 256 }
 0x20a   :  { %p518_p1 = scmp.ne.s32.totalorder %s699_s5, %s517_s18  ;;  %p521_p2 = scmp.lt.u32.totalorder %s517_s18, %s699_s5 }
 0x20c   :  { %p523_p3 = pnand %p521_p2, %p518_p1 }
 0x20e   :  { %526 = shalt.err (!%p523_p3)
}
 0x20f   :  { %286 = dma.vmem_to_hbm [thread:$0]  %s281_s14, 256, %s699_s5, [#allocation4], %s559_s9, %s559_s9, %s560_s10  }
 0x210   :  { %269 = vrot.lane.b32.xlu0 %v436_v44, %s563_s15  ;;  %s564_s25 = smov [#allocation9]  }
 0x211   :  { %s292_s26 = sshll.u32 %s564_s25, 4  ;;  %s293_s26 = int_to_ptr.vmem [resolvable:$true] %s292_s26 }
 0x212   :  { %s527_s27 = scalar_lea.vmem %s293_s26, 256  ;;  %p532_p5 = scmp.lt.s32.totalorder %s293_s26, %s293_s26 }
 0x213   :  { %p528_p4 = scmp.ne.s32.totalorder %s293_s26, %s527_s27  ;;  %p533_p6 = scmp.lt.s32.totalorder %s527_s27, %s527_s27 }
 0x215   :  { %p534_p7 = por %p533_p6, %p532_p5 }
 0x217   :  { %p535_p8 = pnand %p534_p7, %p528_p4 }
 0x279   :  { %v268_v46 = vpop.permute.xlu0 %267 }
 0x27a   :  { %273 = vst.msk [vmem:[#allocation9] sm:$0xff] %vm262_vm1, %v268_v46 }
 0x282   :  { %v270_v47 = vpop.permute.xlu0 %269 }
 0x283   :  { %274 = vst.msk [vmem:[#allocation9 + $0x8] sm:$0xff] %vm262_vm1, %v270_v47 }
 0x284   :  { %538 = shalt.err (!%p535_p8)
}
 0x285   :  { %s539_s5 = scalar_lea.hbm %s700_s6, 256 }
 0x286   :  { %p540_p9 = scmp.ne.s32.totalorder %s700_s6, %s539_s5  ;;  %p543_p10 = scmp.lt.u32.totalorder %s539_s5, %s700_s6 }
 0x288   :  { %p545_p11 = pnand %p543_p10, %p540_p9 }
 0x28a   :  { %548 = shalt.err (!%p545_p11)
}
 0x28b   :  { %298 = dma.vmem_to_hbm [thread:$0]  %s293_s26, 256, %s700_s6, [#allocation10], %s559_s9, %s559_s9, %s560_s10  }
 0x28c   :  { %553 = dma.done.wait [#allocation4], 256  }
 0x28d   :  { %554 = vsyncadd [#allocation4], 4294967040 }
 0x28e   :  { %555 = dma.done.wait [#allocation10], 256  }
 0x28f   :  { %556 = vsyncadd [#allocation10], 4294967040 }
 0x290   :  { %305 = vsyncpa [#allocation3], 1 }
 0x291   :  { %306 = vsyncpa [#allocation6], 1 }
 0x292   :  { %307 = vsyncpa [#allocation4], 1 }
 0x293   :  { %308 = vsyncpa [#allocation10], 1 }

</bundles_post_ra>
